<compile_context>
chip_gen: v7x
topology: tpu7x:2x2x1
jax: 0.10.0
libtpu: 0.0.40
codegen_flags: <defaults>
</compile_context>

<pallas_src>
import math

import jax
import jax.numpy as jnp
from jax import lax
from jax.experimental import pallas as pl
from jax.experimental.pallas import tpu as pltpu  # noqa: F401  (kept for TPU-specific scaling knobs)

# ---- model hyper-parameters (the "configs") ---------------------------------
BATCH = 2
SEQ = 8
HIDDEN = 32
NUM_HEADS = 4
HEAD_DIM = HIDDEN // NUM_HEADS


# ---- Pallas kernel: single invocation, whole problem in VMEM ----------------
def self_attention_kernel(x_ref, mask_ref, w_ref, b_ref, out_ref):
    # x_ref   : (B*S, H)   activations, all batch rows stacked
    # mask_ref: (B, S)     additive mask (0 or -1e9) per batch element
    # w_ref   : (H, 3H)    fused [Wq | Wk | Wv]
    # b_ref   : (1, 3H)    fused [bq | bk | bv]
    # out_ref : (B*S, H)

    # Fused Q/K/V projection: one (B*S,H)x(H,3H) MXU matmul + bias.
    qkv = jnp.dot(x_ref[...], w_ref[...],
                  preferred_element_type=jnp.float32) + b_ref[...]

    scale = 1.0 / math.sqrt(HEAD_DIM)

    # Static (batch, head) loop: pure 2-D matmuls on lane-range column slices,
    # results written straight into the output columns (no transpose/reshape).
    for b in range(BATCH):
        rows = slice(b * SEQ, (b + 1) * SEQ)
        mask_b = mask_ref[b:b + 1, :]                      # (1, S), broadcasts over rows
        for h in range(NUM_HEADS):
            c0 = h * HEAD_DIM
            q = qkv[rows, 0 * HIDDEN + c0:0 * HIDDEN + c0 + HEAD_DIM]  # (S, HD)
            k = qkv[rows, 1 * HIDDEN + c0:1 * HIDDEN + c0 + HEAD_DIM]  # (S, HD)
            v = qkv[rows, 2 * HIDDEN + c0:2 * HIDDEN + c0 + HEAD_DIM]  # (S, HD)

            # Scores: contract head_dim of BOTH operands (no explicit .T).
            scores = lax.dot_general(
                q, k, (((1,), (1,)), ((), ())),
                preferred_element_type=jnp.float32) * scale            # (S, S)
            scores = scores + mask_b

            # Numerically-stable softmax over the key axis (exact division).
            m = jnp.max(scores, axis=-1, keepdims=True)
            p = jnp.exp(scores - m)
            probs = p / jnp.sum(p, axis=-1, keepdims=True)

            # Weighted sum over V and direct column write (head merge for free).
            ctx = jnp.dot(probs, v, preferred_element_type=jnp.float32)  # (S, HD)
            out_ref[rows, c0:c0 + HEAD_DIM] = ctx.astype(out_ref.dtype)


# ---- wrapper -----------------------------------------------------------------
def self_attention(x, attention_mask, params):
    """x: (B, S, H) f32; attention_mask: (B, 1, 1, S) additive f32 mask."""
    B, S, H = x.shape
    x2d = x.reshape(B * S, H).astype(jnp.float32)
    mask2d = attention_mask.reshape(B, S).astype(jnp.float32)

    wq, wk, wv, bq, bk, bv = params
    # Fuse Q/K/V weights and biases in the wrapper (one matmul in the kernel).
    w_qkv = jnp.concatenate([wq, wk, wv], axis=1)              # (H, 3H)
    b_qkv = jnp.concatenate([bq, bk, bv]).reshape(1, 3 * H)    # (1, 3H)

    out2d = pl.pallas_call(
        self_attention_kernel,
        out_shape=jax.ShapeDtypeStruct((B * S, H), jnp.float32),
    )(x2d, mask2d, w_qkv, b_qkv)
    return out2d.reshape(B, S, H)


def transformer_layer_forward(x, attention_mask, params):
    """Mirrors TransformerLayer.forward: runs SelfAttention and prints shape."""
    attention_ = self_attention(x, attention_mask, params)
    print(attention_.shape)
    return attention_


# ---- pure-JAX reference for a correctness check ------------------------------
def reference(x, attention_mask, params):
    wq, wk, wv, bq, bk, bv = params
    B, S, H = x.shape
    q = x @ wq + bq
    k = x @ wk + bk
    v = x @ wv + bv
    q = q.reshape(B, S, NUM_HEADS, HEAD_DIM).transpose(0, 2, 1, 3)
    k = k.reshape(B, S, NUM_HEADS, HEAD_DIM).transpose(0, 2, 1, 3)
    v = v.reshape(B, S, NUM_HEADS, HEAD_DIM).transpose(0, 2, 1, 3)
    scores = jnp.einsum("bhqd,bhkd->bhqk", q, k) / math.sqrt(HEAD_DIM)
    scores = scores + attention_mask  # (B,1,1,S) broadcast
    probs = jax.nn.softmax(scores, axis=-1)
    ctx = jnp.einsum("bhqk,bhkd->bhqd", probs, v)
    return ctx.transpose(0, 2, 1, 3).reshape(B, S, H)


if __name__ == "__main__":
    key = jax.random.PRNGKey(0)
    kx, kq, kk, kv, kbq, kbk, kbv = jax.random.split(key, 7)

    x = jax.random.normal(kx, (BATCH, SEQ, HIDDEN), dtype=jnp.float32)

    # BERT-style additive mask: 0 = attend, -1e9 = masked. Mask the last two
    # positions of batch element 1.
    mask = jnp.zeros((BATCH, 1, 1, SEQ), dtype=jnp.float32)
    mask = mask.at[1, 0, 0, -2:].set(-1e9)

    scale = 0.05
    params = (
        jax.random.normal(kq, (HIDDEN, HIDDEN), dtype=jnp.float32) * scale,
        jax.random.normal(kk, (HIDDEN, HIDDEN), dtype=jnp.float32) * scale,
        jax.random.normal(kv, (HIDDEN, HIDDEN), dtype=jnp.float32) * scale,
        jax.random.normal(kbq, (HIDDEN,), dtype=jnp.float32) * scale,
        jax.random.normal(kbk, (HIDDEN,), dtype=jnp.float32) * scale,
        jax.random.normal(kbv, (HIDDEN,), dtype=jnp.float32) * scale,
    )

    out = transformer_layer_forward(x, mask, params)
    out = jax.block_until_ready(out)

    ref = reference(x, mask, params)
    # Exact-division softmax: tight tolerance again.
    assert jnp.allclose(out, ref, atol=1e-5, rtol=1e-5), "mismatch vs reference"

    print("KERNEL_OK")
</pallas_src>

<mosaic_0001>
module attributes {stable_mosaic.version = 11 : i64} {
  func.func @self_attention_kernel(%arg0: memref<16x32xf32, #tpu.memory_space<vmem>>, %arg1: memref<2x8xf32, #tpu.memory_space<vmem>>, %arg2: memref<32x96xf32, #tpu.memory_space<vmem>>, %arg3: memref<1x96xf32, #tpu.memory_space<vmem>>, %arg4: memref<16x32xf32, #tpu.memory_space<vmem>>) attributes {dimension_semantics = [], scalar_prefetch = 0 : i64, scratch_operands = 0 : i64, tpu.core_type = #tpu.core_type<tc>} {
    %c0 = arith.constant 0 : index
    %c0_0 = arith.constant 0 : index
    %0 = vector.load %arg0[%c0, %c0_0] : memref<16x32xf32, #tpu.memory_space<vmem>>, vector<16x32xf32>
    %c0_1 = arith.constant 0 : index
    %c0_2 = arith.constant 0 : index
    %1 = vector.load %arg2[%c0_1, %c0_2] : memref<32x96xf32, #tpu.memory_space<vmem>>, vector<32x96xf32>
    %cst = arith.constant dense<0.000000e+00> : vector<16x96xf32>
    %2 = tpu.matmul %0, %1, %cst {dimension_numbers = #tpu.dot_dimension_numbers<[1], [0], [0], [1], [0, 0, 1, 1], [], []>} : vector<16x32xf32>, vector<32x96xf32>, vector<16x96xf32> -> vector<16x96xf32>
    %c0_3 = arith.constant 0 : index
    %c0_4 = arith.constant 0 : index
    %3 = vector.load %arg3[%c0_3, %c0_4] : memref<1x96xf32, #tpu.memory_space<vmem>>, vector<1x96xf32>
    %4 = vector.broadcast %3 : vector<1x96xf32> to vector<16x96xf32>
    %5 = arith.addf %2, %4 : vector<16x96xf32>
    %c0_5 = arith.constant 0 : index
    %c0_6 = arith.constant 0 : index
    %6 = vector.load %arg1[%c0_5, %c0_6] : memref<2x8xf32, #tpu.memory_space<vmem>>, vector<1x8xf32>
    %7 = vector.extract_strided_slice %5 {offsets = [0, 0], sizes = [8, 8], strides = [1, 1]} : vector<16x96xf32> to vector<8x8xf32>
    %8 = vector.extract_strided_slice %5 {offsets = [0, 32], sizes = [8, 8], strides = [1, 1]} : vector<16x96xf32> to vector<8x8xf32>
    %9 = vector.extract_strided_slice %5 {offsets = [0, 64], sizes = [8, 8], strides = [1, 1]} : vector<16x96xf32> to vector<8x8xf32>
    %cst_7 = arith.constant dense<0.000000e+00> : vector<8x8xf32>
    %10 = tpu.matmul %7, %8, %cst_7 {dimension_numbers = #tpu.dot_dimension_numbers<[1], [1], [0], [0], [0, 0, 1, 0], [], []>} : vector<8x8xf32>, vector<8x8xf32>, vector<8x8xf32> -> vector<8x8xf32>
    %cst_8 = arith.constant 0.353553385 : f32
    %11 = vector.broadcast %cst_8 : f32 to vector<8x8xf32>
    %12 = arith.mulf %10, %11 : vector<8x8xf32>
    %13 = vector.broadcast %6 : vector<1x8xf32> to vector<8x8xf32>
    %14 = arith.addf %12, %13 : vector<8x8xf32>
    %cst_9 = arith.constant dense<0xFF800000> : vector<8xf32>
    %15 = vector.multi_reduction <maximumf>, %14, %cst_9 [1] : vector<8x8xf32> to vector<8xf32>
    %16 = vector.shape_cast %15 : vector<8xf32> to vector<8x1xf32>
    %17 = vector.broadcast %16 : vector<8x1xf32> to vector<8x8xf32>
    %18 = arith.subf %14, %17 : vector<8x8xf32>
    %19 = math.exp %18 : vector<8x8xf32>
    %cst_10 = arith.constant dense<0.000000e+00> : vector<8xf32>
    %20 = vector.multi_reduction <add>, %19, %cst_10 [1] : vector<8x8xf32> to vector<8xf32>
    %21 = vector.shape_cast %20 : vector<8xf32> to vector<8x1xf32>
    %22 = vector.broadcast %21 : vector<8x1xf32> to vector<8x8xf32>
    %23 = arith.divf %19, %22 : vector<8x8xf32>
    %cst_11 = arith.constant dense<0.000000e+00> : vector<8x8xf32>
    %24 = tpu.matmul %23, %9, %cst_11 {dimension_numbers = #tpu.dot_dimension_numbers<[1], [0], [0], [1], [0, 0, 1, 1], [], []>} : vector<8x8xf32>, vector<8x8xf32>, vector<8x8xf32> -> vector<8x8xf32>
    %c0_12 = arith.constant 0 : index
    %c0_13 = arith.constant 0 : index
    %25 = vector.load %arg4[%c0_12, %c0_13] : memref<16x32xf32, #tpu.memory_space<vmem>>, vector<8x8xf32>
    tpu.vector_store %arg4[%c0_12, %c0_13], %24 {strides = array<i32>} : memref<16x32xf32, #tpu.memory_space<vmem>>, vector<8x8xf32>,
    %26 = vector.extract_strided_slice %5 {offsets = [0, 8], sizes = [8, 8], strides = [1, 1]} : vector<16x96xf32> to vector<8x8xf32>
    %27 = vector.extract_strided_slice %5 {offsets = [0, 40], sizes = [8, 8], strides = [1, 1]} : vector<16x96xf32> to vector<8x8xf32>
    %28 = vector.extract_strided_slice %5 {offsets = [0, 72], sizes = [8, 8], strides = [1, 1]} : vector<16x96xf32> to vector<8x8xf32>
    %cst_14 = arith.constant dense<0.000000e+00> : vector<8x8xf32>
    %29 = tpu.matmul %26, %27, %cst_14 {dimension_numbers = #tpu.dot_dimension_numbers<[1], [1], [0], [0], [0, 0, 1, 0], [], []>} : vector<8x8xf32>, vector<8x8xf32>, vector<8x8xf32> -> vector<8x8xf32>
    %cst_15 = arith.constant 0.353553385 : f32
    %30 = vector.broadcast %cst_15 : f32 to vector<8x8xf32>
    %31 = arith.mulf %29, %30 : vector<8x8xf32>
    %32 = vector.broadcast %6 : vector<1x8xf32> to vector<8x8xf32>
    %33 = arith.addf %31, %32 : vector<8x8xf32>
    %cst_16 = arith.constant dense<0xFF800000> : vector<8xf32>
    %34 = vector.multi_reduction <maximumf>, %33, %cst_16 [1] : vector<8x8xf32> to vector<8xf32>
    %35 = vector.shape_cast %34 : vector<8xf32> to vector<8x1xf32>
    %36 = vector.broadcast %35 : vector<8x1xf32> to vector<8x8xf32>
    %37 = arith.subf %33, %36 : vector<8x8xf32>
    %38 = math.exp %37 : vector<8x8xf32>
    %cst_17 = arith.constant dense<0.000000e+00> : vector<8xf32>
    %39 = vector.multi_reduction <add>, %38, %cst_17 [1] : vector<8x8xf32> to vector<8xf32>
    %40 = vector.shape_cast %39 : vector<8xf32> to vector<8x1xf32>
    %41 = vector.broadcast %40 : vector<8x1xf32> to vector<8x8xf32>
    %42 = arith.divf %38, %41 : vector<8x8xf32>
    %cst_18 = arith.constant dense<0.000000e+00> : vector<8x8xf32>
    %43 = tpu.matmul %42, %28, %cst_18 {dimension_numbers = #tpu.dot_dimension_numbers<[1], [0], [0], [1], [0, 0, 1, 1], [], []>} : vector<8x8xf32>, vector<8x8xf32>, vector<8x8xf32> -> vector<8x8xf32>
    %c0_19 = arith.constant 0 : index
    %c8 = arith.constant 8 : index
    %44 = vector.load %arg4[%c0_19, %c8] : memref<16x32xf32, #tpu.memory_space<vmem>>, vector<8x8xf32>
    tpu.vector_store %arg4[%c0_19, %c8], %43 {strides = array<i32>} : memref<16x32xf32, #tpu.memory_space<vmem>>, vector<8x8xf32>,
    %45 = vector.extract_strided_slice %5 {offsets = [0, 16], sizes = [8, 8], strides = [1, 1]} : vector<16x96xf32> to vector<8x8xf32>
    %46 = vector.extract_strided_slice %5 {offsets = [0, 48], sizes = [8, 8], strides = [1, 1]} : vector<16x96xf32> to vector<8x8xf32>
    %47 = vector.extract_strided_slice %5 {offsets = [0, 80], sizes = [8, 8], strides = [1, 1]} : vector<16x96xf32> to vector<8x8xf32>
    %cst_20 = arith.constant dense<0.000000e+00> : vector<8x8xf32>
    %48 = tpu.matmul %45, %46, %cst_20 {dimension_numbers = #tpu.dot_dimension_numbers<[1], [1], [0], [0], [0, 0, 1, 0], [], []>} : vector<8x8xf32>, vector<8x8xf32>, vector<8x8xf32> -> vector<8x8xf32>
    %cst_21 = arith.constant 0.353553385 : f32
    %49 = vector.broadcast %cst_21 : f32 to vector<8x8xf32>
    %50 = arith.mulf %48, %49 : vector<8x8xf32>
    %51 = vector.broadcast %6 : vector<1x8xf32> to vector<8x8xf32>
    %52 = arith.addf %50, %51 : vector<8x8xf32>
    %cst_22 = arith.constant dense<0xFF800000> : vector<8xf32>
    %53 = vector.multi_reduction <maximumf>, %52, %cst_22 [1] : vector<8x8xf32> to vector<8xf32>
    %54 = vector.shape_cast %53 : vector<8xf32> to vector<8x1xf32>
    %55 = vector.broadcast %54 : vector<8x1xf32> to vector<8x8xf32>
    %56 = arith.subf %52, %55 : vector<8x8xf32>
    %57 = math.exp %56 : vector<8x8xf32>
    %cst_23 = arith.constant dense<0.000000e+00> : vector<8xf32>
    %58 = vector.multi_reduction <add>, %57, %cst_23 [1] : vector<8x8xf32> to vector<8xf32>
    %59 = vector.shape_cast %58 : vector<8xf32> to vector<8x1xf32>
    %60 = vector.broadcast %59 : vector<8x1xf32> to vector<8x8xf32>
    %61 = arith.divf %57, %60 : vector<8x8xf32>
    %cst_24 = arith.constant dense<0.000000e+00> : vector<8x8xf32>
    %62 = tpu.matmul %61, %47, %cst_24 {dimension_numbers = #tpu.dot_dimension_numbers<[1], [0], [0], [1], [0, 0, 1, 1], [], []>} : vector<8x8xf32>, vector<8x8xf32>, vector<8x8xf32> -> vector<8x8xf32>
    %c0_25 = arith.constant 0 : index
    %c16 = arith.constant 16 : index
    %63 = vector.load %arg4[%c0_25, %c16] : memref<16x32xf32, #tpu.memory_space<vmem>>, vector<8x8xf32>
    tpu.vector_store %arg4[%c0_25, %c16], %62 {strides = array<i32>} : memref<16x32xf32, #tpu.memory_space<vmem>>, vector<8x8xf32>,
    %64 = vector.extract_strided_slice %5 {offsets = [0, 24], sizes = [8, 8], strides = [1, 1]} : vector<16x96xf32> to vector<8x8xf32>
    %65 = vector.extract_strided_slice %5 {offsets = [0, 56], sizes = [8, 8], strides = [1, 1]} : vector<16x96xf32> to vector<8x8xf32>
    %66 = vector.extract_strided_slice %5 {offsets = [0, 88], sizes = [8, 8], strides = [1, 1]} : vector<16x96xf32> to vector<8x8xf32>
    %cst_26 = arith.constant dense<0.000000e+00> : vector<8x8xf32>
    %67 = tpu.matmul %64, %65, %cst_26 {dimension_numbers = #tpu.dot_dimension_numbers<[1], [1], [0], [0], [0, 0, 1, 0], [], []>} : vector<8x8xf32>, vector<8x8xf32>, vector<8x8xf32> -> vector<8x8xf32>
    %cst_27 = arith.constant 0.353553385 : f32
    %68 = vector.broadcast %cst_27 : f32 to vector<8x8xf32>
    %69 = arith.mulf %67, %68 : vector<8x8xf32>
    %70 = vector.broadcast %6 : vector<1x8xf32> to vector<8x8xf32>
    %71 = arith.addf %69, %70 : vector<8x8xf32>
    %cst_28 = arith.constant dense<0xFF800000> : vector<8xf32>
    %72 = vector.multi_reduction <maximumf>, %71, %cst_28 [1] : vector<8x8xf32> to vector<8xf32>
    %73 = vector.shape_cast %72 : vector<8xf32> to vector<8x1xf32>
    %74 = vector.broadcast %73 : vector<8x1xf32> to vector<8x8xf32>
    %75 = arith.subf %71, %74 : vector<8x8xf32>
    %76 = math.exp %75 : vector<8x8xf32>
    %cst_29 = arith.constant dense<0.000000e+00> : vector<8xf32>
    %77 = vector.multi_reduction <add>, %76, %cst_29 [1] : vector<8x8xf32> to vector<8xf32>
    %78 = vector.shape_cast %77 : vector<8xf32> to vector<8x1xf32>
    %79 = vector.broadcast %78 : vector<8x1xf32> to vector<8x8xf32>
    %80 = arith.divf %76, %79 : vector<8x8xf32>
    %cst_30 = arith.constant dense<0.000000e+00> : vector<8x8xf32>
    %81 = tpu.matmul %80, %66, %cst_30 {dimension_numbers = #tpu.dot_dimension_numbers<[1], [0], [0], [1], [0, 0, 1, 1], [], []>} : vector<8x8xf32>, vector<8x8xf32>, vector<8x8xf32> -> vector<8x8xf32>
    %c0_31 = arith.constant 0 : index
    %c24 = arith.constant 24 : index
    %82 = vector.load %arg4[%c0_31, %c24] : memref<16x32xf32, #tpu.memory_space<vmem>>, vector<8x8xf32>
    tpu.vector_store %arg4[%c0_31, %c24], %81 {strides = array<i32>} : memref<16x32xf32, #tpu.memory_space<vmem>>, vector<8x8xf32>,
    %c1 = arith.constant 1 : index
    %c0_32 = arith.constant 0 : index
    %83 = vector.load %arg1[%c1, %c0_32] : memref<2x8xf32, #tpu.memory_space<vmem>>, vector<1x8xf32>
    %84 = vector.extract_strided_slice %5 {offsets = [8, 0], sizes = [8, 8], strides = [1, 1]} : vector<16x96xf32> to vector<8x8xf32>
    %85 = vector.extract_strided_slice %5 {offsets = [8, 32], sizes = [8, 8], strides = [1, 1]} : vector<16x96xf32> to vector<8x8xf32>
    %86 = vector.extract_strided_slice %5 {offsets = [8, 64], sizes = [8, 8], strides = [1, 1]} : vector<16x96xf32> to vector<8x8xf32>
    %cst_33 = arith.constant dense<0.000000e+00> : vector<8x8xf32>
    %87 = tpu.matmul %84, %85, %cst_33 {dimension_numbers = #tpu.dot_dimension_numbers<[1], [1], [0], [0], [0, 0, 1, 0], [], []>} : vector<8x8xf32>, vector<8x8xf32>, vector<8x8xf32> -> vector<8x8xf32>
    %cst_34 = arith.constant 0.353553385 : f32
    %88 = vector.broadcast %cst_34 : f32 to vector<8x8xf32>
    %89 = arith.mulf %87, %88 : vector<8x8xf32>
    %90 = vector.broadcast %83 : vector<1x8xf32> to vector<8x8xf32>
    %91 = arith.addf %89, %90 : vector<8x8xf32>
    %cst_35 = arith.constant dense<0xFF800000> : vector<8xf32>
    %92 = vector.multi_reduction <maximumf>, %91, %cst_35 [1] : vector<8x8xf32> to vector<8xf32>
    %93 = vector.shape_cast %92 : vector<8xf32> to vector<8x1xf32>
    %94 = vector.broadcast %93 : vector<8x1xf32> to vector<8x8xf32>
    %95 = arith.subf %91, %94 : vector<8x8xf32>
    %96 = math.exp %95 : vector<8x8xf32>
    %cst_36 = arith.constant dense<0.000000e+00> : vector<8xf32>
    %97 = vector.multi_reduction <add>, %96, %cst_36 [1] : vector<8x8xf32> to vector<8xf32>
    %98 = vector.shape_cast %97 : vector<8xf32> to vector<8x1xf32>
    %99 = vector.broadcast %98 : vector<8x1xf32> to vector<8x8xf32>
    %100 = arith.divf %96, %99 : vector<8x8xf32>
    %cst_37 = arith.constant dense<0.000000e+00> : vector<8x8xf32>
    %101 = tpu.matmul %100, %86, %cst_37 {dimension_numbers = #tpu.dot_dimension_numbers<[1], [0], [0], [1], [0, 0, 1, 1], [], []>} : vector<8x8xf32>, vector<8x8xf32>, vector<8x8xf32> -> vector<8x8xf32>
    %c8_38 = arith.constant 8 : index
    %c0_39 = arith.constant 0 : index
    %102 = vector.load %arg4[%c8_38, %c0_39] : memref<16x32xf32, #tpu.memory_space<vmem>>, vector<8x8xf32>
    tpu.vector_store %arg4[%c8_38, %c0_39], %101 {strides = array<i32>} : memref<16x32xf32, #tpu.memory_space<vmem>>, vector<8x8xf32>,
    %103 = vector.extract_strided_slice %5 {offsets = [8, 8], sizes = [8, 8], strides = [1, 1]} : vector<16x96xf32> to vector<8x8xf32>
    %104 = vector.extract_strided_slice %5 {offsets = [8, 40], sizes = [8, 8], strides = [1, 1]} : vector<16x96xf32> to vector<8x8xf32>
    %105 = vector.extract_strided_slice %5 {offsets = [8, 72], sizes = [8, 8], strides = [1, 1]} : vector<16x96xf32> to vector<8x8xf32>
    %cst_40 = arith.constant dense<0.000000e+00> : vector<8x8xf32>
    %106 = tpu.matmul %103, %104, %cst_40 {dimension_numbers = #tpu.dot_dimension_numbers<[1], [1], [0], [0], [0, 0, 1, 0], [], []>} : vector<8x8xf32>, vector<8x8xf32>, vector<8x8xf32> -> vector<8x8xf32>
    %cst_41 = arith.constant 0.353553385 : f32
    %107 = vector.broadcast %cst_41 : f32 to vector<8x8xf32>
    %108 = arith.mulf %106, %107 : vector<8x8xf32>
    %109 = vector.broadcast %83 : vector<1x8xf32> to vector<8x8xf32>
    %110 = arith.addf %108, %109 : vector<8x8xf32>
    %cst_42 = arith.constant dense<0xFF800000> : vector<8xf32>
    %111 = vector.multi_reduction <maximumf>, %110, %cst_42 [1] : vector<8x8xf32> to vector<8xf32>
    %112 = vector.shape_cast %111 : vector<8xf32> to vector<8x1xf32>
    %113 = vector.broadcast %112 : vector<8x1xf32> to vector<8x8xf32>
    %114 = arith.subf %110, %113 : vector<8x8xf32>
    %115 = math.exp %114 : vector<8x8xf32>
    %cst_43 = arith.constant dense<0.000000e+00> : vector<8xf32>
    %116 = vector.multi_reduction <add>, %115, %cst_43 [1] : vector<8x8xf32> to vector<8xf32>
    %117 = vector.shape_cast %116 : vector<8xf32> to vector<8x1xf32>
    %118 = vector.broadcast %117 : vector<8x1xf32> to vector<8x8xf32>
    %119 = arith.divf %115, %118 : vector<8x8xf32>
    %cst_44 = arith.constant dense<0.000000e+00> : vector<8x8xf32>
    %120 = tpu.matmul %119, %105, %cst_44 {dimension_numbers = #tpu.dot_dimension_numbers<[1], [0], [0], [1], [0, 0, 1, 1], [], []>} : vector<8x8xf32>, vector<8x8xf32>, vector<8x8xf32> -> vector<8x8xf32>
    %c8_45 = arith.constant 8 : index
    %c8_46 = arith.constant 8 : index
    %121 = vector.load %arg4[%c8_45, %c8_46] : memref<16x32xf32, #tpu.memory_space<vmem>>, vector<8x8xf32>
    tpu.vector_store %arg4[%c8_45, %c8_46], %120 {strides = array<i32>} : memref<16x32xf32, #tpu.memory_space<vmem>>, vector<8x8xf32>,
    %122 = vector.extract_strided_slice %5 {offsets = [8, 16], sizes = [8, 8], strides = [1, 1]} : vector<16x96xf32> to vector<8x8xf32>
    %123 = vector.extract_strided_slice %5 {offsets = [8, 48], sizes = [8, 8], strides = [1, 1]} : vector<16x96xf32> to vector<8x8xf32>
    %124 = vector.extract_strided_slice %5 {offsets = [8, 80], sizes = [8, 8], strides = [1, 1]} : vector<16x96xf32> to vector<8x8xf32>
    %cst_47 = arith.constant dense<0.000000e+00> : vector<8x8xf32>
    %125 = tpu.matmul %122, %123, %cst_47 {dimension_numbers = #tpu.dot_dimension_numbers<[1], [1], [0], [0], [0, 0, 1, 0], [], []>} : vector<8x8xf32>, vector<8x8xf32>, vector<8x8xf32> -> vector<8x8xf32>
    %cst_48 = arith.constant 0.353553385 : f32
    %126 = vector.broadcast %cst_48 : f32 to vector<8x8xf32>
    %127 = arith.mulf %125, %126 : vector<8x8xf32>
    %128 = vector.broadcast %83 : vector<1x8xf32> to vector<8x8xf32>
    %129 = arith.addf %127, %128 : vector<8x8xf32>
    %cst_49 = arith.constant dense<0xFF800000> : vector<8xf32>
    %130 = vector.multi_reduction <maximumf>, %129, %cst_49 [1] : vector<8x8xf32> to vector<8xf32>
    %131 = vector.shape_cast %130 : vector<8xf32> to vector<8x1xf32>
    %132 = vector.broadcast %131 : vector<8x1xf32> to vector<8x8xf32>
    %133 = arith.subf %129, %132 : vector<8x8xf32>
    %134 = math.exp %133 : vector<8x8xf32>
    %cst_50 = arith.constant dense<0.000000e+00> : vector<8xf32>
    %135 = vector.multi_reduction <add>, %134, %cst_50 [1] : vector<8x8xf32> to vector<8xf32>
    %136 = vector.shape_cast %135 : vector<8xf32> to vector<8x1xf32>
    %137 = vector.broadcast %136 : vector<8x1xf32> to vector<8x8xf32>
    %138 = arith.divf %134, %137 : vector<8x8xf32>
    %cst_51 = arith.constant dense<0.000000e+00> : vector<8x8xf32>
    %139 = tpu.matmul %138, %124, %cst_51 {dimension_numbers = #tpu.dot_dimension_numbers<[1], [0], [0], [1], [0, 0, 1, 1], [], []>} : vector<8x8xf32>, vector<8x8xf32>, vector<8x8xf32> -> vector<8x8xf32>
    %c8_52 = arith.constant 8 : index
    %c16_53 = arith.constant 16 : index
    %140 = vector.load %arg4[%c8_52, %c16_53] : memref<16x32xf32, #tpu.memory_space<vmem>>, vector<8x8xf32>
    tpu.vector_store %arg4[%c8_52, %c16_53], %139 {strides = array<i32>} : memref<16x32xf32, #tpu.memory_space<vmem>>, vector<8x8xf32>,
    %141 = vector.extract_strided_slice %5 {offsets = [8, 24], sizes = [8, 8], strides = [1, 1]} : vector<16x96xf32> to vector<8x8xf32>
    %142 = vector.extract_strided_slice %5 {offsets = [8, 56], sizes = [8, 8], strides = [1, 1]} : vector<16x96xf32> to vector<8x8xf32>
    %143 = vector.extract_strided_slice %5 {offsets = [8, 88], sizes = [8, 8], strides = [1, 1]} : vector<16x96xf32> to vector<8x8xf32>
    %cst_54 = arith.constant dense<0.000000e+00> : vector<8x8xf32>
    %144 = tpu.matmul %141, %142, %cst_54 {dimension_numbers = #tpu.dot_dimension_numbers<[1], [1], [0], [0], [0, 0, 1, 0], [], []>} : vector<8x8xf32>, vector<8x8xf32>, vector<8x8xf32> -> vector<8x8xf32>
    %cst_55 = arith.constant 0.353553385 : f32
    %145 = vector.broadcast %cst_55 : f32 to vector<8x8xf32>
    %146 = arith.mulf %144, %145 : vector<8x8xf32>
    %147 = vector.broadcast %83 : vector<1x8xf32> to vector<8x8xf32>
    %148 = arith.addf %146, %147 : vector<8x8xf32>
    %cst_56 = arith.constant dense<0xFF800000> : vector<8xf32>
    %149 = vector.multi_reduction <maximumf>, %148, %cst_56 [1] : vector<8x8xf32> to vector<8xf32>
    %150 = vector.shape_cast %149 : vector<8xf32> to vector<8x1xf32>
    %151 = vector.broadcast %150 : vector<8x1xf32> to vector<8x8xf32>
    %152 = arith.subf %148, %151 : vector<8x8xf32>
    %153 = math.exp %152 : vector<8x8xf32>
    %cst_57 = arith.constant dense<0.000000e+00> : vector<8xf32>
    %154 = vector.multi_reduction <add>, %153, %cst_57 [1] : vector<8x8xf32> to vector<8xf32>
    %155 = vector.shape_cast %154 : vector<8xf32> to vector<8x1xf32>
    %156 = vector.broadcast %155 : vector<8x1xf32> to vector<8x8xf32>
    %157 = arith.divf %153, %156 : vector<8x8xf32>
    %cst_58 = arith.constant dense<0.000000e+00> : vector<8x8xf32>
    %158 = tpu.matmul %157, %143, %cst_58 {dimension_numbers = #tpu.dot_dimension_numbers<[1], [0], [0], [1], [0, 0, 1, 1], [], []>} : vector<8x8xf32>, vector<8x8xf32>, vector<8x8xf32> -> vector<8x8xf32>
    %c8_59 = arith.constant 8 : index
    %c24_60 = arith.constant 24 : index
    %159 = vector.load %arg4[%c8_59, %c24_60] : memref<16x32xf32, #tpu.memory_space<vmem>>, vector<8x8xf32>
    tpu.vector_store %arg4[%c8_59, %c24_60], %158 {strides = array<i32>} : memref<16x32xf32, #tpu.memory_space<vmem>>, vector<8x8xf32>,
    return
  }
}

</mosaic_0001>

<bundles_post_ra>
// kernel: tpu_custom_call.1
= control target key start
LH: loop header
LB: loop body
LE: loop exit
PB: predicated region body
PF: predicated region fallthrough
CT: control target
= control target key end

     0   :  { %9 = vsyncpa [#allocation3], 0  ;;  %s2075_s0 = inlined_call_operand.hbm [shape: f32[16,32], index: 0, kind: input, shape index: {}]   ;;  %s2076_s1 = inlined_call_operand.vmem [shape: f32[2,8], index: 1, kind: input, shape index: {}]   ;;  %s2077_s2 = inlined_call_operand.hbm [shape: f32[32,96], index: 2, kind: input, shape index: {}]   ;;  %s2078_s3 = inlined_call_operand.vmem [shape: f32[1,96], index: 3, kind: input, shape index: {}]   ;;  %s2079_s4 = inlined_call_operand.hbm [shape: f32[16,32], index: 4, kind: output, shape index: {}]  }
   0x1   :  { %10 = vsyncpa [#allocation6], 0 }
   0x2   :  { %11 = vsyncpa [#allocation4], 0  ;;  %s1829_s15 = smov [#allocation2]   ;;  %s1757_s19 = scalar_lea.hbm %s2075_s0, 256 }
   0x3   :  { %s17_s16 = sshll.u32 %s1829_s15, 4  ;;  %p1758_p0 = scmp.ne.s32.totalorder %s2075_s0, %s1757_s19  ;;  %s18_s16 = int_to_ptr.vmem [resolvable:$true] %s17_s16 }
   0x4   :  { %p1761_p1 = scmp.lt.u32.totalorder %s1757_s19, %s2075_s0 }
   0x6   :  { %p1763_p2 = pnand %p1761_p1, %p1758_p0 }
   0x8   :  { %1766 = shalt.err (!%p1763_p2)
}
   0x9   :  { %s1767_s24 = scalar_lea.vmem %s18_s16, 256  ;;  %p1772_p4 = scmp.lt.s32.totalorder %s18_s16, %s18_s16 }
   0xa   :  { %p1768_p3 = scmp.ne.s32.totalorder %s18_s16, %s1767_s24  ;;  %p1773_p5 = scmp.lt.s32.totalorder %s1767_s24, %s1767_s24 }
   0xc   :  { %p1774_p6 = por %p1773_p5, %p1772_p4 }
   0xe   :  { %p1775_p7 = pnand %p1774_p6, %p1768_p3 }
  0x10   :  { %1778 = shalt.err (!%p1775_p7)
}
  0x11   :  { %s1830_s25 = smov 128   ;;  %s1831_s26 = smov 8  }
  0x12   :  { %23 = dma.hbm_to_vmem [thread:$0]  %s2075_s0, 256, %s18_s16, [#allocation3], %s1830_s25, %s1830_s25, %s1831_s26  }
  0x13   :  { %s1832_s29 = smov [#allocation5]   ;;  %s1779_s7 = scalar_lea.hbm %s2077_s2, 512 }
  0x14   :  { %s31_s30 = sshll.u32 %s1832_s29, 4  ;;  %p1780_p8 = scmp.ne.s32.totalorder %s2077_s2, %s1779_s7  ;;  %s32_s30 = int_to_ptr.vmem [resolvable:$true] %s31_s30 }
  0x15   :  { %p1783_p9 = scmp.lt.u32.totalorder %s1779_s7, %s2077_s2 }
  0x17   :  { %p1785_p10 = pnand %p1783_p9, %p1780_p8 }
  0x19   :  { %1788 = shalt.err (!%p1785_p10)
}
  0x1a   :  { %s1789_s12 = scalar_lea.vmem %s32_s30, 512  ;;  %p1794_p12 = scmp.lt.s32.totalorder %s32_s30, %s32_s30 }
  0x1b   :  { %p1790_p11 = scmp.ne.s32.totalorder %s32_s30, %s1789_s12  ;;  %p1795_p13 = scmp.lt.s32.totalorder %s1789_s12, %s1789_s12 }
  0x1d   :  { %p1796_p0 = por %p1795_p13, %p1794_p12 }
  0x1f   :  { %p1797_p1 = pnand %p1796_p0, %p1790_p11 }
  0x21   :  { %1800 = shalt.err (!%p1797_p1)
}
  0x22   :  { %37 = dma.hbm_to_vmem [thread:$0]  %s2077_s2, 512, %s32_s30, [#allocation6], %s1830_s25, %s1830_s25, %s1831_s26  }
  0x23   :  { %1823 = dma.done.wait [#allocation3], 256  }
  0x24   :  { %1824 = vsyncadd [#allocation3], 4294967040 }
  0x25   :  { %1825 = dma.done.wait [#allocation6], 512  }
  0x26   :  { %1826 = vsyncadd [#allocation6], 4294966784  ;;  %vm59_vm0 = vcmask 261120   ;;  %v48_v0 = vld [vmem:[#allocation5] sm:$0xff]  ;;  %v49_v1 = vld [vmem:[#allocation5 + $0x8] sm:$0xff]  ;;  %v1833_v8 = vmov 0.0  }
  0x27   :  { %v50_v2 = vld [vmem:[#allocation5 + $0x10] sm:$0xff]  ;;  %v1697_v3 = vpack.c.bf16 %v49_v1, %v48_v0  ;;  %v51_v4 = vld [vmem:[#allocation5 + $0x18] sm:$0xff]  ;;  %1617 = vmatprep.subr.mxu1 %v1833_v8  ;;  %vm1834_vm1 = vmmov 0   ;;  %s1835_s15 = smov 120   ;;  %s1836_s16 = smov 96   ;;  %vm145_vm2 = vcmask 64512  }
  0x28   :  { %v46_v5 = vld [vmem:[#allocation2] sm:$0xff]  ;;  %v1701_v6 = vpack.c.bf16 %v51_v4, %v50_v2  ;;  %v47_v7 = vld [vmem:[#allocation2 + $0x8] sm:$0xff]  ;;  %1619 = vmatprep.mubr.msk.f32.mxu1 %vm1834_vm1, %v1833_v8  ;;  %s1837_s17 = smov 80   ;;  %s1838_s18 = smov 88   ;;  %vm485_vm3 = vcmask 130112   ;;  %vm658_vm4 = vcmask 195712  }
  0x29   :  { %1614 = vmatprep.mubr.msk.f32.mxu0 %vm59_vm0, %v46_v5  ;;  %1698 = vmatprep.subr.bf16.mxu0 %v1697_v3  ;;  %v1539_v9 = vld [vmem:[%s2078_s3] ss:$0 sm:$0xff]  ;;  %s1839_s19 = smov 72   ;;  %s1840_s3 = smov 112   ;;  %v1557_v50 = vld [vmem:[%s2076_s1 + $0x1] ss:$0 sm:$0xff] }
  0x2a   :  { %1700 = vmatpush3.bf16.msra.mxu0 %v1697_v3  ;;  %s1841_s20 = smov 104   ;;  %s1842_s21 = smov 56   ;;  %v1544_v30 = vld [vmem:[%s2076_s1] ss:$0 sm:$0xff]  ;;  %vm831_vm5 = vcmask 261312  }
  0x2b   :  { %1702 = vmatprep.subr.bf16.mxu0 %v1701_v6  ;;  %s1843_s22 = smov 64   ;;  %s1844_s1 = smov 40  }
  0x2c   :  { %s1845_s29 = smov 48   ;;  %s1846_s30 = smov 16  }
  0x2d   :  { %s1847_s5 = smov 24   ;;  %s1848_s6 = smov [#allocation7]  }
  0x2e   :  { %1704 = vmatpush3.bf16.msra.mxu0 %v1701_v6  ;;  %s1526_s7 = sshll.u32 %s1848_s6, 4  ;;  %s1527_s7 = int_to_ptr.vmem [resolvable:$true] %s1526_s7 }
  0x2f   :  { %1627 = vmatprep.subr.mxu0 %v1833_v8  ;;  %s1801_s8 = scalar_lea.vmem %s1527_s7, 256  ;;  %p1806_p3 = scmp.lt.s32.totalorder %s1527_s7, %s1527_s7 }
  0x30   :  { %p1802_p2 = scmp.ne.s32.totalorder %s1527_s7, %s1801_s8  ;;  %p1807_p4 = scmp.lt.s32.totalorder %s1801_s8, %s1801_s8 }
  0x31   :  { %1615 = vmatmul.mubr.msk.f32.vlgmr.msra.gmra.mrb[0].mxu0 %vm59_vm0, %v47_v7 }
  0x32   :  { %1629 = vmatprep.mubr.msk.f32.mxu0 %vm1834_vm1, %v1833_v8  ;;  %p1808_p5 = por %p1807_p4, %p1806_p3 }
  0x34   :  { %p1809_p6 = pnand %p1808_p5, %p1802_p2 }
 0x104   :  { %v1616_v10 = vpop.f32.mrb[0].mxu0 }
 0x105   :  { %v132_v11 = vpop.f32.mrb[1].mxu0  ;;  %v1921_v13 = vadd.f32 %v1616_v10, %v1539_v9 }
 0x106   :  { %v1913_v12 = vadd.f32 %v1539_v9, %v132_v11 }
 0x108   :  { %314 = vrot.lane.b32.xlu1 %v1913_v12, %s1835_s15  ;;  %143 = vrot.lane.b32.xlu0 %v1913_v12, %s1836_s16 }
 0x10c   :  { %489 = vrot.lane.b32.xlu1 %v1913_v12, %s1837_s17  ;;  %316 = vrot.lane.b32.xlu0 %v1913_v12, %s1838_s18 }
 0x110   :  { %662 = vrot.lane.b32.xlu1 %v1913_v12, %s1839_s19  ;;  %487 = vrot.lane.b32.xlu0 %v1913_v12, %s1840_s3 }
 0x114   :  { %835 = vrot.lane.b32.xlu1 %v1921_v13, %s1836_s16  ;;  %660 = vrot.lane.b32.xlu0 %v1913_v12, %s1841_s20 }
 0x118   :  { %1005 = vrot.lane.b32.xlu1 %v1921_v13, %s1835_s15  ;;  %1007 = vrot.lane.b32.xlu0 %v1921_v13, %s1838_s18 }
 0x11c   :  { %1177 = vrot.lane.b32.xlu1 %v1921_v13, %s1840_s3  ;;  %1179 = vrot.lane.b32.xlu0 %v1921_v13, %s1837_s17 }
 0x120   :  { %1349 = vrot.lane.b32.xlu1 %v1921_v13, %s1841_s20  ;;  %1351 = vrot.lane.b32.xlu0 %v1921_v13, %s1839_s19 }
 0x124   :  { %405 = vrot.lane.b32.xlu1 %v1913_v12, %s1842_s21  ;;  %237 = vrot.lane.b32.xlu0 %v1913_v12, %s1843_s22 }
 0x17a   :  { %v315_v14 = vpop.permute.xlu1 %314  ;;  %v144_v15 = vpop.permute.xlu0 %143 }
 0x17b   :  { %1618 = vmatpush3.xpose.msk.msra.mxu1 %vm145_vm2, %v144_v15 }
 0x17c   :  { %1622 = vmatprep.subr.mxu1 %v1833_v8 }
 0x17e   :  { %v490_v16 = vpop.permute.xlu1 %489  ;;  %1620 = vmatmul.mubr.msk.f32.vlgmr.msra.gmra.mrb[0].mxu1 %vm145_vm2, %v1913_v12  ;;  %v317_v17 = vpop.permute.xlu0 %316 }
 0x17f   :  { %1628 = vmatpush3.xpose.msk.msra.mxu0 %vm145_vm2, %v317_v17  ;;  %1624 = vmatprep.mubr.msk.f32.mxu1 %vm1834_vm1, %v1833_v8 }
 0x180   :  { %1637 = vmatprep.subr.mxu0 %v1833_v8 }
 0x182   :  { %v663_v18 = vpop.permute.xlu1 %662  ;;  %1630 = vmatmul.mubr.msk.f32.vlgmr.msra.gmra.mrb[2].mxu0 %vm145_vm2, %v315_v14  ;;  %v488_v19 = vpop.permute.xlu0 %487 }
 0x183   :  { %1638 = vmatpush3.xpose.msk.msra.mxu0 %vm145_vm2, %v490_v16  ;;  %1639 = vmatprep.mubr.msk.f32.mxu0 %vm1834_vm1, %v1833_v8 }
 0x184   :  { %1647 = vmatprep.subr.mxu0 %v1833_v8 }
 0x186   :  { %1640 = vmatmul.mubr.msk.f32.vlgmr.msra.gmra.mrb[4].mxu0 %vm145_vm2, %v488_v19  ;;  %v661_v20 = vpop.permute.xlu0 %660  ;;  %v836_v21 = vpop.permute.xlu1 %835 }
 0x187   :  { %1648 = vmatpush3.xpose.msk.msra.mxu0 %vm145_vm2, %v663_v18  ;;  %1649 = vmatprep.mubr.msk.f32.mxu0 %vm1834_vm1, %v1833_v8 }
 0x188   :  { %1657 = vmatprep.subr.mxu0 %v1833_v8 }
 0x18a   :  { %1650 = vmatmul.mubr.msk.f32.vlgmr.msra.gmra.mrb[6].mxu0 %vm145_vm2, %v661_v20  ;;  %v1008_v22 = vpop.permute.xlu0 %1007  ;;  %v1006_v23 = vpop.permute.xlu1 %1005 }
 0x18b   :  { %1658 = vmatpush3.xpose.msk.msra.mxu0 %vm145_vm2, %v836_v21  ;;  %1659 = vmatprep.mubr.msk.f32.mxu0 %vm1834_vm1, %v1833_v8 }
 0x18c   :  { %1667 = vmatprep.subr.mxu0 %v1833_v8 }
 0x18e   :  { %1660 = vmatmul.mubr.msk.f32.vlgmr.msra.gmra.mrb[8].mxu0 %vm145_vm2, %v1921_v13  ;;  %v1180_v24 = vpop.permute.xlu0 %1179  ;;  %v1178_v26 = vpop.permute.xlu1 %1177 }
 0x18f   :  { %1668 = vmatpush3.xpose.msk.msra.mxu0 %vm145_vm2, %v1008_v22  ;;  %1669 = vmatprep.mubr.msk.f32.mxu0 %vm1834_vm1, %v1833_v8 }
 0x190   :  { %1677 = vmatprep.subr.mxu0 %v1833_v8 }
 0x192   :  { %1670 = vmatmul.mubr.msk.f32.vlgmr.msra.gmra.mrb[10].mxu0 %vm145_vm2, %v1006_v23  ;;  %v1352_v25 = vpop.permute.xlu0 %1351  ;;  %v1350_v28 = vpop.permute.xlu1 %1349 }
 0x193   :  { %1678 = vmatpush3.xpose.msk.msra.mxu0 %vm145_vm2, %v1180_v24  ;;  %1679 = vmatprep.mubr.msk.f32.mxu0 %vm1834_vm1, %v1833_v8 }
 0x194   :  { %1687 = vmatprep.subr.mxu0 %v1833_v8 }
 0x196   :  { %1680 = vmatmul.mubr.msk.f32.vlgmr.msra.gmra.mrb[12].mxu0 %vm145_vm2, %v1178_v26  ;;  %v238_v27 = vpop.permute.xlu0 %237  ;;  %v1993_v7 = vpop.permute.xlu1 %405 }
 0x197   :  { %1623 = vmatpush3.msra.mxu1 %v238_v27  ;;  %1688 = vmatpush3.xpose.msk.msra.mxu0 %vm145_vm2, %v1352_v25 }
 0x198   :  { %1689 = vmatprep.mubr.msk.f32.mxu0 %vm1834_vm1, %v1833_v8  ;;  %1632 = vmatprep.subr.mxu1 %v1833_v8 }
 0x19a   :  { %1690 = vmatmul.mubr.msk.f32.vlgmr.msra.gmra.mrb[14].mxu0 %vm145_vm2, %v1350_v28 }
 0x251   :  { %v216_v29 = vpop.f32.mrb[0].mxu1 }
 0x252   :  { %v220_v31 = vmul.f32 0.35355338, %v216_v29  ;;  %v1621_v32 = vpop.f32.mrb[1].mxu1 }
 0x254   :  { %v225_v33 = vadd.f32 %v1544_v30, %v220_v31 }
 0x255   :  { %v388_v34 = vpop.f32.mrb[2].mxu0 }
 0x256   :  { %v392_v35 = vmul.f32 0.35355338, %v388_v34  ;;  %v1631_v36 = vpop.f32.mrb[3].mxu0  ;;  %v226_v37 = vsel %vm145_vm2, %v225_v33, -inf }
 0x257   :  { %227 = vmax.xlane.f32.xlu0 %v226_v37 }
 0x258   :  { %v393_v38 = vadd.f32 %v1544_v30, %v392_v35 }
 0x259   :  { %v561_v39 = vpop.f32.mrb[4].mxu0 }
 0x25a   :  { %v565_v40 = vmul.f32 0.35355338, %v561_v39  ;;  %v1641_v41 = vpop.f32.mrb[5].mxu0  ;;  %v394_v42 = vsel %vm145_vm2, %v393_v38, -inf }
 0x25b   :  { %395 = vmax.xlane.f32.xlu1 %v394_v42 }
 0x25c   :  { %v566_v43 = vadd.f32 %v1544_v30, %v565_v40 }
 0x25d   :  { %v734_v44 = vpop.f32.mrb[6].mxu0 }
 0x25e   :  { %v738_v45 = vmul.f32 0.35355338, %v734_v44  ;;  %v1651_v46 = vpop.f32.mrb[7].mxu0  ;;  %v567_v47 = vsel %vm145_vm2, %v566_v43, -inf }
 0x25f   :  { %568 = vmax.xlane.f32.xlu0 %v567_v47 }
 0x260   :  { %v739_v48 = vadd.f32 %v1544_v30, %v738_v45 }
 0x261   :  { %v907_v49 = vpop.f32.mrb[8].mxu0 }
 0x262   :  { %v911_v51 = vmul.f32 0.35355338, %v907_v49  ;;  %v1661_v52 = vpop.f32.mrb[9].mxu0  ;;  %v740_v53 = vsel %vm145_vm2, %v739_v48, -inf }
 0x263   :  { %741 = vmax.xlane.f32.xlu0 %v740_v53 }
 0x264   :  { %v916_v54 = vadd.f32 %v1557_v50, %v911_v51 }
 0x265   :  { %v1079_v55 = vpop.f32.mrb[10].mxu0 }
 0x266   :  { %v1083_v56 = vmul.f32 0.35355338, %v1079_v55  ;;  %v1671_v57 = vpop.f32.mrb[11].mxu0  ;;  %v917_v58 = vsel %vm145_vm2, %v916_v54, -inf }
 0x267   :  { %918 = vmax.xlane.f32.xlu1 %v917_v58 }
 0x268   :  { %v1084_v59 = vadd.f32 %v1557_v50, %v1083_v56 }
 0x269   :  { %v1251_v60 = vpop.f32.mrb[12].mxu0 }
 0x26a   :  { %v1255_v61 = vmul.f32 0.35355338, %v1251_v60  ;;  %v1681_v62 = vpop.f32.mrb[13].mxu0  ;;  %v1085_v63 = vsel %vm145_vm2, %v1084_v59, -inf }
 0x26b   :  { %1086 = vmax.xlane.f32.xlu0 %v1085_v63 }
 0x26c   :  { %v1256_v0 = vadd.f32 %v1557_v50, %v1255_v61 }
 0x26d   :  { %v1423_v1 = vpop.f32.mrb[14].mxu0 }
 0x26e   :  { %v1427_v2 = vmul.f32 0.35355338, %v1423_v1  ;;  %v1691_v3 = vpop.f32.mrb[15].mxu0  ;;  %v1257_v4 = vsel %vm145_vm2, %v1256_v0, -inf }
 0x26f   :  { %1258 = vmax.xlane.f32.xlu1 %v1257_v4 }
 0x270   :  { %v1428_v5 = vadd.f32 %v1557_v50, %v1427_v2 }
 0x272   :  { %v1429_v6 = vsel %vm145_vm2, %v1428_v5, -inf }
 0x273   :  { %1430 = vmax.xlane.f32.xlu0 %v1429_v6 }
 0x280   :  { %751 = vrot.lane.b32.xlu1 %v1913_v12, %s1844_s1 }
 0x289   :  { %578 = vrot.lane.b32.xlu0 %v1913_v12, %s1845_s29 }
 0x2e4   :  { %v228_v9 = vpop.xlane.xlu0 %227 }
 0x2e5   :  { %v229_v10 = vsub.f32 %v225_v33, %v228_v9 }
 0x2e7   :  { %v230_v11 = vmul.f32 1.442695, %v229_v10 }
 0x2e8   :  { %v396_v14 = vpop.xlane.xlu1 %395 }
 0x2e9   :  { %1725 = vpow2.f32 %v230_v11  ;;  %v397_v15 = vsub.f32 %v393_v38, %v396_v14 }
 0x2eb   :  { %v398_v16 = vmul.f32 1.442695, %v397_v15 }
 0x2ec   :  { %v569_v17 = vpop.xlane.xlu0 %568 }
 0x2ed   :  { %1727 = vpow2.f32 %v398_v16  ;;  %v570_v18 = vsub.f32 %v566_v43, %v569_v17 }
 0x2ef   :  { %v571_v19 = vmul.f32 1.442695, %v570_v18 }
 0x2f0   :  { %v742_v20 = vpop.xlane.xlu0 %741 }
 0x2f1   :  { %1729 = vpow2.f32 %v571_v19  ;;  %v743_v21 = vsub.f32 %v739_v48, %v742_v20 }
 0x2f3   :  { %v1726_v22 = vpop.eup %1725  ;;  %v744_v23 = vmul.f32 1.442695, %v743_v21 }
 0x2f4   :  { %v232_v12 = vsel %vm145_vm2, %v1726_v22, 0.0  ;;  %v919_v30 = vpop.xlane.xlu1 %918 }
 0x2f5   :  { %1731 = vpow2.f32 %v744_v23  ;;  %233 = vadd.xlane.f32.xlu1 %v232_v12  ;;  %v920_v31 = vsub.f32 %v916_v54, %v919_v30 }
 0x2f7   :  { %v1728_v24 = vpop.eup %1727  ;;  %v921_v35 = vmul.f32 1.442695, %v920_v31 }
 0x2f8   :  { %v400_v25 = vsel %vm145_vm2, %v1728_v24, 0.0  ;;  %v1087_v32 = vpop.xlane.xlu0 %1086 }
 0x2f9   :  { %401 = vadd.xlane.f32.xlu0 %v400_v25  ;;  %v1088_v34 = vsub.f32 %v1084_v59, %v1087_v32  ;;  %1733 = vpow2.f32 %v921_v35 }
 0x2fb   :  { %v1730_v26 = vpop.eup %1729  ;;  %v1089_v38 = vmul.f32 1.442695, %v1088_v34 }
 0x2fc   :  { %v573_v27 = vsel %vm145_vm2, %v1730_v26, 0.0  ;;  %v1259_v33 = vpop.xlane.xlu1 %1258 }
 0x2fd   :  { %574 = vadd.xlane.f32.xlu1 %v573_v27  ;;  %v1260_v36 = vsub.f32 %v1256_v0, %v1259_v33  ;;  %1735 = vpow2.f32 %v1089_v38 }
 0x2ff   :  { %v1998_v28 = vpop.eup %1731  ;;  %v1261_v39 = vmul.f32 1.442695, %v1260_v36 }
 0x300   :  { %v746_v29 = vsel %vm145_vm2, %v1998_v28, 0.0  ;;  %v1431_v37 = vpop.xlane.xlu0 %1430  ;;  %v752_v50 = vpop.permute.xlu1 %751 }
 0x301   :  { %747 = vadd.xlane.f32.xlu0 %v746_v29  ;;  %v1432_v40 = vsub.f32 %v1428_v5, %v1431_v37  ;;  %1737 = vpow2.f32 %v1261_v39 }
 0x303   :  { %v1433_v41 = vmul.f32 1.442695, %v1432_v40  ;;  %v1734_v42 = vpop.eup %1733 }
 0x304   :  { %v923_v44 = vsel %vm145_vm2, %v1734_v42, 0.0  ;;  %v579_v51 = vpop.permute.xlu0 %578 }
 0x305   :  { %1739 = vpow2.f32 %v1433_v41 }
 0x307   :  { %v2006_v43 = vpop.eup %1735 }
 0x308   :  { %v1091_v47 = vsel %vm145_vm2, %v2006_v43, 0.0 }
 0x30b   :  { %v2009_v45 = vpop.eup %1737 }
 0x30c   :  { %v1263_v46 = vsel %vm145_vm2, %v2009_v45, 0.0 }
 0x30e   :  { %1096 = vrot.lane.b32.xlu1 %v1921_v13, %s1842_s21 }
 0x30f   :  { %v2015_v48 = vpop.eup %1739 }
 0x310   :  { %v1435_v49 = vsel %vm145_vm2, %v2015_v48, 0.0 }
 0x317   :  { %928 = vrot.lane.b32.xlu0 %v1921_v13, %s1843_s22 }
 0x332   :  { %924 = vadd.xlane.f32.xlu1 %v923_v44 }
 0x336   :  { %1264 = vadd.xlane.f32.xlu1 %v1263_v46  ;;  %1092 = vadd.xlane.f32.xlu0 %v1091_v47 }
 0x33a   :  { %1436 = vadd.xlane.f32.xlu1 %v1435_v49 }
 0x34b   :  { %1440 = vrot.lane.b32.xlu1 %v1921_v13, %s1844_s1 }
 0x34c   :  { %1268 = vrot.lane.b32.xlu0 %v1921_v13, %s1845_s29 }
 0x382   :  { %v234_v52 = vpop.xlane.xlu1 %233 }
 0x383   :  { %1741 = vrcp.f32 %v234_v52 }
 0x386   :  { %v402_v53 = vpop.xlane.xlu0 %401 }
 0x387   :  { %1743 = vrcp.f32 %v402_v53 }
 0x38a   :  { %v575_v54 = vpop.xlane.xlu1 %574 }
 0x38b   :  { %1745 = vrcp.f32 %v575_v54 }
 0x38d   :  { %v1742_v55 = vpop.eup %1741 }
 0x38e   :  { %v236_v56 = vmul.f32 %v1742_v55, %v1726_v22  ;;  %v748_v57 = vpop.xlane.xlu0 %747  ;;  %v1097_v0 = vpop.permute.xlu1 %1096 }
 0x38f   :  { %1747 = vrcp.f32 %v748_v57 }
 0x390   :  { %1625 = vmatmul.mubr.msk.f32.vlgmr.msra.gmra.mrb[2].mxu1 %vm145_vm2, %v236_v56 }
 0x391   :  { %v1744_v58 = vpop.eup %1743  ;;  %1633 = vmatpush3.msra.mxu1 %v1993_v7  ;;  %1634 = vmatprep.mubr.msk.f32.mxu1 %vm1834_vm1, %v1833_v8 }
 0x392   :  { %v404_v13 = vmul.f32 %v1744_v58, %v1728_v24  ;;  %1642 = vmatprep.subr.mxu1 %v1833_v8  ;;  %v929_v63 = vpop.permute.xlu0 %928 }
 0x394   :  { %1635 = vmatmul.mubr.msk.f32.vlgmr.msra.gmra.mrb[4].mxu1 %vm145_vm2, %v404_v13 }
 0x395   :  { %v1746_v59 = vpop.eup %1745  ;;  %1643 = vmatpush3.msra.mxu1 %v579_v51  ;;  %1644 = vmatprep.mubr.msk.f32.mxu1 %vm1834_vm1, %v1833_v8 }
 0x396   :  { %v577_v60 = vmul.f32 %v1746_v59, %v1730_v26  ;;  %1652 = vmatprep.subr.mxu1 %v1833_v8 }
 0x398   :  { %1645 = vmatmul.mubr.msk.f32.vlgmr.msra.gmra.mrb[6].mxu1 %vm145_vm2, %v577_v60 }
 0x399   :  { %v1748_v61 = vpop.eup %1747  ;;  %1653 = vmatpush3.msra.mxu1 %v752_v50  ;;  %1654 = vmatprep.mubr.msk.f32.mxu1 %vm1834_vm1, %v1833_v8 }
 0x39a   :  { %v750_v62 = vmul.f32 %v1748_v61, %v1998_v28  ;;  %1662 = vmatprep.subr.mxu1 %v1833_v8 }
 0x39c   :  { %1655 = vmatmul.mubr.msk.f32.vlgmr.msra.gmra.mrb[8].mxu1 %vm145_vm2, %v750_v62 }
 0x39d   :  { %1663 = vmatpush3.msra.mxu1 %v929_v63  ;;  %1664 = vmatprep.mubr.msk.f32.mxu1 %vm1834_vm1, %v1833_v8 }
 0x39e   :  { %1672 = vmatprep.subr.mxu1 %v1833_v8 }
 0x3bf   :  { %v925_v1 = vpop.xlane.xlu1 %924 }
 0x3c0   :  { %1749 = vrcp.f32 %v925_v1 }
 0x3c3   :  { %v1265_v2 = vpop.xlane.xlu1 %1264  ;;  %v1093_v3 = vpop.xlane.xlu0 %1092 }
 0x3c4   :  { %1751 = vrcp.f32 %v1093_v3 }
 0x3c5   :  { %1753 = vrcp.f32 %v1265_v2 }
 0x3c7   :  { %v1437_v4 = vpop.xlane.xlu1 %1436  ;;  %v1269_v11 = vpop.permute.xlu0 %1268 }
 0x3c8   :  { %1755 = vrcp.f32 %v1437_v4 }
 0x3ca   :  { %v1750_v5 = vpop.eup %1749 }
 0x3cb   :  { %v927_v6 = vmul.f32 %v1750_v5, %v1734_v42  ;;  %v1441_v16 = vpop.permute.xlu1 %1440 }
 0x3cd   :  { %1665 = vmatmul.mubr.msk.f32.vlgmr.msra.gmra.mrb[10].mxu1 %vm145_vm2, %v927_v6 }
 0x3ce   :  { %1673 = vmatpush3.msra.mxu1 %v1097_v0  ;;  %1674 = vmatprep.mubr.msk.f32.mxu1 %vm1834_vm1, %v1833_v8  ;;  %v1752_v7 = vpop.eup %1751 }
 0x3cf   :  { %1682 = vmatprep.subr.mxu1 %v1833_v8  ;;  %v1095_v9 = vmul.f32 %v1752_v7, %v2006_v43  ;;  %v1754_v10 = vpop.eup %1753 }
 0x3d0   :  { %v1267_v14 = vmul.f32 %v1754_v10, %v2009_v45 }
 0x3d1   :  { %1675 = vmatmul.mubr.msk.f32.vlgmr.msra.gmra.mrb[12].mxu1 %vm145_vm2, %v1095_v9 }
 0x3d2   :  { %1683 = vmatpush3.msra.mxu1 %v1269_v11  ;;  %1684 = vmatprep.mubr.msk.f32.mxu1 %vm1834_vm1, %v1833_v8  ;;  %v1756_v15 = vpop.eup %1755 }
 0x3d3   :  { %1692 = vmatprep.subr.mxu1 %v1833_v8  ;;  %v1439_v17 = vmul.f32 %v1756_v15, %v2015_v48 }
 0x3d5   :  { %1685 = vmatmul.mubr.msk.f32.vlgmr.msra.gmra.mrb[14].mxu1 %vm145_vm2, %v1267_v14 }
 0x3d6   :  { %1693 = vmatpush3.msra.mxu1 %v1441_v16  ;;  %1694 = vmatprep.mubr.msk.f32.mxu1 %vm1834_vm1, %v1833_v8 }
 0x3d9   :  { %1695 = vmatmul.mubr.msk.f32.vlgmr.msra.gmra.mrb[16].mxu1 %vm145_vm2, %v1439_v17 }
 0x463   :  { %v309_v18 = vpop.f32.mrb[2].mxu1 }
 0x464   :  { %313 = vst.msk [vmem:[#allocation7] sm:$0xff] %vm145_vm2, %v309_v18  ;;  %v1626_v19 = vpop.f32.mrb[3].mxu1 }
 0x467   :  { %v477_v20 = vpop.f32.mrb[4].mxu1 }
 0x468   :  { %482 = vrot.lane.b32.xlu0 %v477_v20, %s1831_s26  ;;  %v1636_v21 = vpop.f32.mrb[5].mxu1 }
 0x46b   :  { %v650_v22 = vpop.f32.mrb[6].mxu1 }
 0x46c   :  { %655 = vrot.lane.b32.xlu1 %v650_v22, %s1846_s30  ;;  %v1646_v23 = vpop.f32.mrb[7].mxu1 }
 0x46f   :  { %v823_v12 = vpop.f32.mrb[8].mxu1 }
 0x470   :  { %828 = vrot.lane.b32.xlu0 %v823_v12, %s1847_s5  ;;  %v1656_v8 = vpop.f32.mrb[9].mxu1 }
 0x4a0   :  { %v1000_v24 = vpop.f32.mrb[10].mxu1 }
 0x4a1   :  { %1004 = vst.msk [vmem:[#allocation7 + $0x8] sm:$0xff] %vm145_vm2, %v1000_v24  ;;  %v1666_v25 = vpop.f32.mrb[11].mxu1 }
 0x4a4   :  { %v1168_v26 = vpop.f32.mrb[12].mxu1 }
 0x4a5   :  { %1173 = vrot.lane.b32.xlu1 %v1168_v26, %s1831_s26  ;;  %v1676_v27 = vpop.f32.mrb[13].mxu1 }
 0x4a8   :  { %v1340_v28 = vpop.f32.mrb[14].mxu1 }
 0x4a9   :  { %1345 = vrot.lane.b32.xlu0 %v1340_v28, %s1846_s30  ;;  %v1686_v29 = vpop.f32.mrb[15].mxu1 }
 0x4ac   :  { %v1512_v30 = vpop.f32.mrb[16].mxu1 }
 0x4ad   :  { %1517 = vrot.lane.b32.xlu1 %v1512_v30, %s1847_s5  ;;  %v1696_v31 = vpop.f32.mrb[17].mxu1 }
 0x4da   :  { %v483_v32 = vpop.permute.xlu0 %482 }
 0x4db   :  { %486 = vst.msk [vmem:[#allocation7] sm:$0xff] %vm485_vm3, %v483_v32 }
 0x4de   :  { %v656_v33 = vpop.permute.xlu1 %655 }
 0x4df   :  { %659 = vst.msk [vmem:[#allocation7] sm:$0xff] %vm658_vm4, %v656_v33 }
 0x4e2   :  { %v829_v34 = vpop.permute.xlu0 %828 }
 0x4e3   :  { %832 = vst.msk [vmem:[#allocation7] sm:$0xff] %vm831_vm5, %v829_v34 }
 0x517   :  { %v1174_v35 = vpop.permute.xlu1 %1173 }
 0x518   :  { %1176 = vst.msk [vmem:[#allocation7 + $0x8] sm:$0xff] %vm485_vm3, %v1174_v35 }
 0x51b   :  { %v1346_v36 = vpop.permute.xlu0 %1345 }
 0x51c   :  { %1348 = vst.msk [vmem:[#allocation7 + $0x8] sm:$0xff] %vm658_vm4, %v1346_v36 }
 0x51f   :  { %v1518_v37 = vpop.permute.xlu1 %1517 }
 0x520   :  { %1520 = vst.msk [vmem:[#allocation7 + $0x8] sm:$0xff] %vm831_vm5, %v1518_v37 }
 0x521   :  { %1812 = shalt.err (!%p1809_p6)
}
 0x522   :  { %s1813_s11 = scalar_lea.hbm %s2079_s4, 256 }
 0x523   :  { %p1814_p7 = scmp.ne.s32.totalorder %s2079_s4, %s1813_s11  ;;  %p1817_p8 = scmp.lt.u32.totalorder %s1813_s11, %s2079_s4 }
 0x525   :  { %p1819_p9 = pnand %p1817_p8, %p1814_p7 }
 0x527   :  { %1822 = shalt.err (!%p1819_p9)
}
 0x528   :  { %1532 = dma.vmem_to_hbm [thread:$0]  %s1527_s7, 256, %s2079_s4, [#allocation4], %s1830_s25, %s1830_s25, %s1831_s26  }
 0x529   :  { %1827 = dma.done.wait [#allocation4], 256  }
 0x52a   :  { %1828 = vsyncadd [#allocation4], 4294967040 }
 0x52b   :  { %1536 = vsyncpa [#allocation3], 1 }
 0x52c   :  { %1537 = vsyncpa [#allocation6], 1 }
 0x52d   :  { %1538 = vsyncpa [#allocation4], 1 }

</bundles_post_ra>
